<compile_context>
chip_gen: v6e
topology: v6e:2x2x1
jax: 0.10.0
libtpu: 0.0.40
codegen_flags: <defaults>
</compile_context>

<pallas_src>
import jax
import jax.numpy as jnp
from jax import lax
from jax.experimental import pallas as pl
from jax.experimental.pallas import tpu as pltpu

# ---- module / problem configuration -----------------------------------------
IN_CH = 24            # input_channels == 24  => first_group = 1
OUT_CH = 24           # stride=1 residual add requires out == in
GROUPS = 3
MID = OUT_CH // 4     # mid_channels = 6
H = W = 16
HW = H * W
B = 2
EPS = 1e-5


# ---- Pallas kernel -----------------------------------------------------------
def shuffle_unit_kernel(x_ref, w1_ref, b1_ref, wd_ref, bd_ref, w2_ref, b2_ref,
                        mask_ref, o_ref):
    xb = x_ref[0]                                     # (IN_CH, HW)  C-on-sublane, HW-on-lane

    # group_conv1 (1x1, groups=1) + BN1 + channel shuffle (all folded into w1/b1)
    y1 = jnp.dot(w1_ref[...], xb, preferred_element_type=jnp.float32) + b1_ref[...]   # (MID, HW)

    # 3x3 depthwise conv (+ BN2): 9 lane rolls on the XLU + per-channel FMAs on the VPU.
    # Wrapped positions from the roll land only on border pixels, overwritten below.
    wd = wd_ref[...]                                  # (MID, 9)  loaded once before the tap loop
    acc = jnp.zeros((MID, HW), jnp.float32)
    for di in range(3):
        for dj in range(3):
            off = W * (di - 1) + (dj - 1)             # flat spatial offset of this tap
            k = 3 * di + dj
            rolled = y1 if off == 0 else pltpu.roll(y1, (-off) % HW, axis=1)
            acc = acc + rolled * wd[:, k:k + 1]       # (MID, HW) * (MID, 1)
    acc = acc + bd_ref[...]                           # (MID, HW)

    # group_conv2 (1x1 grouped, padding=1) + BN3 + ReLU (weights pre-densified / folded)
    y2 = jnp.dot(w2_ref[...], acc, preferred_element_type=jnp.float32) + b2_ref[...]  # (OUT_CH, HW)
    y2 = jnp.maximum(y2, 0.0)
    border = jnp.maximum(b2_ref[...], 0.0)            # border pixels see only bias (zero padding)
    y2_full = jnp.where(mask_ref[...] != 0.0, y2, border)   # (OUT_CH, HW)

    # residual add + final ReLU  (lane-dense (24, 256) store)
    o_ref[0] = jnp.maximum(xb + y2_full, 0.0)


@jax.jit
def shuffle_unit_pallas(x_flat, w1, b1, wd, bd, w2, b2, mask):
    return pl.pallas_call(
        shuffle_unit_kernel,
        out_shape=jax.ShapeDtypeStruct((B, OUT_CH, HW), jnp.float32),
        grid_spec=pltpu.PrefetchScalarGridSpec(
            num_scalar_prefetch=0,
            grid=(B,),                                 # B=2: shards across the 2 TCs on v7x;
            in_specs=[                                 # negligible serial overhead on v5e/v6e
                pl.BlockSpec((1, IN_CH, HW), lambda b: (b, 0, 0)),
                pl.BlockSpec((MID, IN_CH), lambda b: (0, 0)),
                pl.BlockSpec((MID, 1), lambda b: (0, 0)),
                pl.BlockSpec((MID, 9), lambda b: (0, 0)),
                pl.BlockSpec((MID, 1), lambda b: (0, 0)),
                pl.BlockSpec((OUT_CH, MID), lambda b: (0, 0)),
                pl.BlockSpec((OUT_CH, 1), lambda b: (0, 0)),
                pl.BlockSpec((1, HW), lambda b: (0, 0)),
            ],
            out_specs=pl.BlockSpec((1, OUT_CH, HW), lambda b: (b, 0, 0)),
        ),
        compiler_params=pltpu.CompilerParams(dimension_semantics=("parallel",)),
    )(x_flat, w1, b1, wd, bd, w2, b2, mask)


# ---- deterministic parameter construction (glue) -----------------------------
def init_raw_params(key):
    keys = list(jax.random.split(key, 20))
    it = iter(keys)

    def nrm(shape, scale=1.0):
        return scale * jax.random.normal(next(it), shape, jnp.float32)

    def bn_params(n):
        return (1.0 + 0.1 * nrm((n,)),            # gamma
                0.1 * nrm((n,)),                  # beta
                0.1 * nrm((n,)),                  # running_mean
                jnp.abs(nrm((n,))) + 0.5)         # running_var

    return dict(
        W1=nrm((MID, IN_CH), 0.25), bc1=nrm((MID,), 0.1), bn1=bn_params(MID),
        Wd=nrm((MID, 3, 3), 0.25), bdc=nrm((MID,), 0.1), bn2=bn_params(MID),
        W2g=nrm((OUT_CH, MID // GROUPS), 0.25), b2=nrm((OUT_CH,), 0.1), bn3=bn_params(OUT_CH),
    )


def make_w2dense(W2g):
    og, ig = OUT_CH // GROUPS, MID // GROUPS
    W2dense = jnp.zeros((OUT_CH, MID), jnp.float32)
    for g in range(GROUPS):
        W2dense = W2dense.at[g * og:(g + 1) * og, g * ig:(g + 1) * ig].set(W2g[g * og:(g + 1) * og])
    return W2dense


def fold_params(p):
    def bn_scale_shift(bn):
        g, be, m, v = bn
        s = g / jnp.sqrt(v + EPS)
        return s, be - s * m

    s1, t1 = bn_scale_shift(p["bn1"])
    s2, t2 = bn_scale_shift(p["bn2"])
    s3, t3 = bn_scale_shift(p["bn3"])

    # channel-shuffle permutation (groups=3) folded into conv1 output channels
    perm = jnp.arange(MID).reshape(GROUPS, MID // GROUPS).T.reshape(-1)
    W1f = (s1[:, None] * p["W1"])[perm]                          # (MID, IN_CH)
    b1f = (s1 * p["bc1"] + t1)[perm]                             # (MID,)

    wd_eff = s2[:, None, None] * p["Wd"]                         # (MID, 3, 3)
    bd_eff = s2 * p["bdc"] + t2

    W2f = s3[:, None] * make_w2dense(p["W2g"])                   # (OUT_CH, MID)
    b2c = s3 * p["b2"] + t3

    return (W1f,                                                 # (MID, IN_CH)
            b1f[:, None],                                        # (MID, 1)
            wd_eff.reshape(MID, 9),                              # (MID, 9)  [c, 3*di+dj]
            bd_eff[:, None],                                     # (MID, 1)
            W2f,                                                 # (OUT_CH, MID)
            b2c[:, None])                                        # (OUT_CH, 1)


def make_interior_mask():
    ii = jnp.arange(HW) // W
    jj = jnp.arange(HW) % W
    interior = (ii >= 1) & (ii <= H - 2) & (jj >= 1) & (jj <= W - 2)
    return interior.astype(jnp.float32)[None, :]                 # (1, HW)


# ---- pure-JAX reference (mirrors the PyTorch forward, NCHW, eval-mode BN) -----
def reference_forward(x_nchw, p):
    def bn(x, bnp):
        g, be, m, v = bnp
        sh = (1, -1, 1, 1)
        return g.reshape(sh) * (x - m.reshape(sh)) / jnp.sqrt(v.reshape(sh) + EPS) + be.reshape(sh)

    y = jnp.einsum('mc,bchw->bmhw', p["W1"], x_nchw) + p["bc1"].reshape(1, -1, 1, 1)
    y = bn(y, p["bn1"])
    b_, n_, h_, w_ = y.shape
    y = y.reshape(b_, GROUPS, n_ // GROUPS, h_, w_).transpose(0, 2, 1, 3, 4).reshape(b_, n_, h_, w_)
    z = jnp.zeros((b_, n_, h_ - 2, w_ - 2), jnp.float32)
    for di in range(3):
        for dj in range(3):
            z = z + y[:, :, di:di + h_ - 2, dj:dj + w_ - 2] * p["Wd"][None, :, di, dj, None, None]
    z = z + p["bdc"].reshape(1, -1, 1, 1)
    z = bn(z, p["bn2"])
    z = jnp.pad(z, ((0, 0), (0, 0), (1, 1), (1, 1)))
    q = jnp.einsum('om,bmhw->bohw', make_w2dense(p["W2g"]), z) + p["b2"].reshape(1, -1, 1, 1)
    q = bn(q, p["bn3"])
    q = jax.nn.relu(q)
    return jax.nn.relu(x_nchw + q)


if __name__ == "__main__":
    key = jax.random.PRNGKey(0)
    kx, kp = jax.random.split(key)
    x_nchw = jax.random.normal(kx, (B, IN_CH, H, W), jnp.float32)   # PyTorch-style NCHW input
    raw = init_raw_params(kp)
    folded = fold_params(raw)
    mask = make_interior_mask()

    # NCHW -> (B, C, H*W): channels on sublane, flattened spatial on lane (pure reshape)
    x_flat = x_nchw.reshape(B, IN_CH, HW)
    out_flat = shuffle_unit_pallas(x_flat, *folded, mask)
    out_flat = jax.block_until_ready(out_flat)
    out_nchw = out_flat.reshape(B, OUT_CH, H, W)

    ref = reference_forward(x_nchw, raw)
    assert out_nchw.shape == (B, OUT_CH, H, W)
    err = float(jnp.max(jnp.abs(out_nchw - ref)))
    assert err < 1e-3, f"max abs err {err}"
    print("KERNEL_OK")
</pallas_src>

<mosaic_0001>
module attributes {stable_mosaic.version = 11 : i64} {
  func.func @shuffle_unit_kernel(%arg0: i32, %arg1: memref<1x24x256xf32, #tpu.memory_space<vmem>>, %arg2: memref<6x24xf32, #tpu.memory_space<vmem>>, %arg3: memref<6x1xf32, #tpu.memory_space<vmem>>, %arg4: memref<6x9xf32, #tpu.memory_space<vmem>>, %arg5: memref<6x1xf32, #tpu.memory_space<vmem>>, %arg6: memref<24x6xf32, #tpu.memory_space<vmem>>, %arg7: memref<24x1xf32, #tpu.memory_space<vmem>>, %arg8: memref<1x256xf32, #tpu.memory_space<vmem>>, %arg9: memref<1x24x256xf32, #tpu.memory_space<vmem>>) attributes {dimension_semantics = [#tpu.dimension_semantics<parallel>], iteration_bounds = array<i64: 2>, scalar_prefetch = 0 : i64, scratch_operands = 0 : i64, tpu.core_type = #tpu.core_type<tc>, window_params = [{transform_indices = @transform_0, window_bounds = array<i64: 1, 24, 256>}, {pipeline_mode = #tpu.pipeline_mode<synchronous>, transform_indices = @transform_1, window_bounds = array<i64: 6, 24>}, {pipeline_mode = #tpu.pipeline_mode<synchronous>, transform_indices = @transform_2, window_bounds = array<i64: 6, 1>}, {pipeline_mode = #tpu.pipeline_mode<synchronous>, transform_indices = @transform_3, window_bounds = array<i64: 6, 9>}, {pipeline_mode = #tpu.pipeline_mode<synchronous>, transform_indices = @transform_4, window_bounds = array<i64: 6, 1>}, {pipeline_mode = #tpu.pipeline_mode<synchronous>, transform_indices = @transform_5, window_bounds = array<i64: 24, 6>}, {pipeline_mode = #tpu.pipeline_mode<synchronous>, transform_indices = @transform_6, window_bounds = array<i64: 24, 1>}, {pipeline_mode = #tpu.pipeline_mode<synchronous>, transform_indices = @transform_7, window_bounds = array<i64: 1, 256>}, {transform_indices = @transform_8, window_bounds = array<i64: 1, 24, 256>}]} {
    %c0 = arith.constant 0 : index
    %c0_0 = arith.constant 0 : index
    %c0_1 = arith.constant 0 : index
    %0 = vector.load %arg1[%c0, %c0_0, %c0_1] : memref<1x24x256xf32, #tpu.memory_space<vmem>>, vector<1x24x256xf32>
    %1 = vector.shape_cast %0 : vector<1x24x256xf32> to vector<24x256xf32>
    %c0_2 = arith.constant 0 : index
    %c0_3 = arith.constant 0 : index
    %2 = vector.load %arg2[%c0_2, %c0_3] : memref<6x24xf32, #tpu.memory_space<vmem>>, vector<6x24xf32>
    %cst = arith.constant dense<0.000000e+00> : vector<6x256xf32>
    %3 = tpu.matmul %2, %1, %cst {dimension_numbers = #tpu.dot_dimension_numbers<[1], [0], [0], [1], [0, 0, 1, 1], [], []>} : vector<6x24xf32>, vector<24x256xf32>, vector<6x256xf32> -> vector<6x256xf32>
    %c0_4 = arith.constant 0 : index
    %c0_5 = arith.constant 0 : index
    %4 = vector.load %arg3[%c0_4, %c0_5] : memref<6x1xf32, #tpu.memory_space<vmem>>, vector<6x1xf32>
    %5 = vector.broadcast %4 : vector<6x1xf32> to vector<6x256xf32>
    %6 = arith.addf %3, %5 : vector<6x256xf32>
    %c0_6 = arith.constant 0 : index
    %c0_7 = arith.constant 0 : index
    %7 = vector.load %arg4[%c0_6, %c0_7] : memref<6x9xf32, #tpu.memory_space<vmem>>, vector<6x9xf32>
    %cst_8 = arith.constant 0.000000e+00 : f32
    %8 = vector.broadcast %cst_8 : f32 to vector<6x256xf32>
    %c17_i32 = arith.constant 17 : i32
    %9 = tpu.dynamic_rotate %6 by %c17_i32 dim 1 : vector<6x256xf32>, i32 -> vector<6x256xf32>
    %10 = vector.extract_strided_slice %7 {offsets = [0, 0], sizes = [6, 1], strides = [1, 1]} : vector<6x9xf32> to vector<6x1xf32>
    %11 = vector.broadcast %10 : vector<6x1xf32> to vector<6x256xf32>
    %12 = arith.mulf %9, %11 : vector<6x256xf32>
    %13 = arith.addf %8, %12 : vector<6x256xf32>
    %c16_i32 = arith.constant 16 : i32
    %14 = tpu.dynamic_rotate %6 by %c16_i32 dim 1 : vector<6x256xf32>, i32 -> vector<6x256xf32>
    %15 = vector.extract_strided_slice %7 {offsets = [0, 1], sizes = [6, 1], strides = [1, 1]} : vector<6x9xf32> to vector<6x1xf32>
    %16 = vector.broadcast %15 : vector<6x1xf32> to vector<6x256xf32>
    %17 = arith.mulf %14, %16 : vector<6x256xf32>
    %18 = arith.addf %13, %17 : vector<6x256xf32>
    %c15_i32 = arith.constant 15 : i32
    %19 = tpu.dynamic_rotate %6 by %c15_i32 dim 1 : vector<6x256xf32>, i32 -> vector<6x256xf32>
    %20 = vector.extract_strided_slice %7 {offsets = [0, 2], sizes = [6, 1], strides = [1, 1]} : vector<6x9xf32> to vector<6x1xf32>
    %21 = vector.broadcast %20 : vector<6x1xf32> to vector<6x256xf32>
    %22 = arith.mulf %19, %21 : vector<6x256xf32>
    %23 = arith.addf %18, %22 : vector<6x256xf32>
    %c1_i32 = arith.constant 1 : i32
    %24 = tpu.dynamic_rotate %6 by %c1_i32 dim 1 : vector<6x256xf32>, i32 -> vector<6x256xf32>
    %25 = vector.extract_strided_slice %7 {offsets = [0, 3], sizes = [6, 1], strides = [1, 1]} : vector<6x9xf32> to vector<6x1xf32>
    %26 = vector.broadcast %25 : vector<6x1xf32> to vector<6x256xf32>
    %27 = arith.mulf %24, %26 : vector<6x256xf32>
    %28 = arith.addf %23, %27 : vector<6x256xf32>
    %29 = vector.extract_strided_slice %7 {offsets = [0, 4], sizes = [6, 1], strides = [1, 1]} : vector<6x9xf32> to vector<6x1xf32>
    %30 = vector.broadcast %29 : vector<6x1xf32> to vector<6x256xf32>
    %31 = arith.mulf %6, %30 : vector<6x256xf32>
    %32 = arith.addf %28, %31 : vector<6x256xf32>
    %c255_i32 = arith.constant 255 : i32
    %33 = tpu.dynamic_rotate %6 by %c255_i32 dim 1 : vector<6x256xf32>, i32 -> vector<6x256xf32>
    %34 = vector.extract_strided_slice %7 {offsets = [0, 5], sizes = [6, 1], strides = [1, 1]} : vector<6x9xf32> to vector<6x1xf32>
    %35 = vector.broadcast %34 : vector<6x1xf32> to vector<6x256xf32>
    %36 = arith.mulf %33, %35 : vector<6x256xf32>
    %37 = arith.addf %32, %36 : vector<6x256xf32>
    %c241_i32 = arith.constant 241 : i32
    %38 = tpu.dynamic_rotate %6 by %c241_i32 dim 1 : vector<6x256xf32>, i32 -> vector<6x256xf32>
    %39 = vector.extract_strided_slice %7 {offsets = [0, 6], sizes = [6, 1], strides = [1, 1]} : vector<6x9xf32> to vector<6x1xf32>
    %40 = vector.broadcast %39 : vector<6x1xf32> to vector<6x256xf32>
    %41 = arith.mulf %38, %40 : vector<6x256xf32>
    %42 = arith.addf %37, %41 : vector<6x256xf32>
    %c240_i32 = arith.constant 240 : i32
    %43 = tpu.dynamic_rotate %6 by %c240_i32 dim 1 : vector<6x256xf32>, i32 -> vector<6x256xf32>
    %44 = vector.extract_strided_slice %7 {offsets = [0, 7], sizes = [6, 1], strides = [1, 1]} : vector<6x9xf32> to vector<6x1xf32>
    %45 = vector.broadcast %44 : vector<6x1xf32> to vector<6x256xf32>
    %46 = arith.mulf %43, %45 : vector<6x256xf32>
    %47 = arith.addf %42, %46 : vector<6x256xf32>
    %c239_i32 = arith.constant 239 : i32
    %48 = tpu.dynamic_rotate %6 by %c239_i32 dim 1 : vector<6x256xf32>, i32 -> vector<6x256xf32>
    %49 = vector.extract_strided_slice %7 {offsets = [0, 8], sizes = [6, 1], strides = [1, 1]} : vector<6x9xf32> to vector<6x1xf32>
    %50 = vector.broadcast %49 : vector<6x1xf32> to vector<6x256xf32>
    %51 = arith.mulf %48, %50 : vector<6x256xf32>
    %52 = arith.addf %47, %51 : vector<6x256xf32>
    %c0_9 = arith.constant 0 : index
    %c0_10 = arith.constant 0 : index
    %53 = vector.load %arg5[%c0_9, %c0_10] : memref<6x1xf32, #tpu.memory_space<vmem>>, vector<6x1xf32>
    %54 = vector.broadcast %53 : vector<6x1xf32> to vector<6x256xf32>
    %55 = arith.addf %52, %54 : vector<6x256xf32>
    %c0_11 = arith.constant 0 : index
    %c0_12 = arith.constant 0 : index
    %56 = vector.load %arg6[%c0_11, %c0_12] : memref<24x6xf32, #tpu.memory_space<vmem>>, vector<24x6xf32>
    %cst_13 = arith.constant dense<0.000000e+00> : vector<24x256xf32>
    %57 = tpu.matmul %56, %55, %cst_13 {dimension_numbers = #tpu.dot_dimension_numbers<[1], [0], [0], [1], [0, 0, 1, 1], [], []>} : vector<24x6xf32>, vector<6x256xf32>, vector<24x256xf32> -> vector<24x256xf32>
    %c0_14 = arith.constant 0 : index
    %c0_15 = arith.constant 0 : index
    %58 = vector.load %arg7[%c0_14, %c0_15] : memref<24x1xf32, #tpu.memory_space<vmem>>, vector<24x1xf32>
    %59 = vector.broadcast %58 : vector<24x1xf32> to vector<24x256xf32>
    %60 = arith.addf %57, %59 : vector<24x256xf32>
    %cst_16 = arith.constant 0.000000e+00 : f32
    %61 = vector.broadcast %cst_16 : f32 to vector<24x256xf32>
    %62 = arith.maximumf %60, %61 : vector<24x256xf32>
    %c0_17 = arith.constant 0 : index
    %c0_18 = arith.constant 0 : index
    %63 = vector.load %arg7[%c0_17, %c0_18] : memref<24x1xf32, #tpu.memory_space<vmem>>, vector<24x1xf32>
    %cst_19 = arith.constant 0.000000e+00 : f32
    %64 = vector.broadcast %cst_19 : f32 to vector<24x1xf32>
    %65 = arith.maximumf %63, %64 : vector<24x1xf32>
    %c0_20 = arith.constant 0 : index
    %c0_21 = arith.constant 0 : index
    %66 = vector.load %arg8[%c0_20, %c0_21] : memref<1x256xf32, #tpu.memory_space<vmem>>, vector<1x256xf32>
    %cst_22 = arith.constant 0.000000e+00 : f32
    %67 = vector.broadcast %cst_22 : f32 to vector<1x256xf32>
    %68 = arith.cmpf one, %66, %67 : vector<1x256xf32>
    %69 = vector.shape_cast %68 : vector<1x256xi1> to vector<1x256xi1>
    %70 = vector.broadcast %69 : vector<1x256xi1> to vector<24x256xi1>
    %71 = vector.shape_cast %65 : vector<24x1xf32> to vector<24x1xf32>
    %72 = vector.broadcast %71 : vector<24x1xf32> to vector<24x256xf32>
    %73 = arith.select %70, %62, %72 : vector<24x256xi1>, vector<24x256xf32>
    %74 = arith.addf %1, %73 : vector<24x256xf32>
    %cst_23 = arith.constant 0.000000e+00 : f32
    %75 = vector.broadcast %cst_23 : f32 to vector<24x256xf32>
    %76 = arith.maximumf %74, %75 : vector<24x256xf32>
    %c0_24 = arith.constant 0 : index
    %c0_25 = arith.constant 0 : index
    %c0_26 = arith.constant 0 : index
    %77 = vector.load %arg9[%c0_24, %c0_25, %c0_26] : memref<1x24x256xf32, #tpu.memory_space<vmem>>, vector<1x24x256xf32>
    %78 = vector.shape_cast %77 : vector<1x24x256xf32> to vector<24x256xf32>
    %79 = vector.shape_cast %76 : vector<24x256xf32> to vector<1x24x256xf32>
    tpu.vector_store %arg9[%c0_24, %c0_25, %c0_26], %79 {strides = array<i32>} : memref<1x24x256xf32, #tpu.memory_space<vmem>>, vector<1x24x256xf32>,
    return
  }
  func.func @transform_0(%arg0: i32) -> (i32, i32, i32) {
    %c0_i32 = arith.constant 0 : i32
    %c0_i32_0 = arith.constant 0 : i32
    %c0_i32_1 = arith.constant 0 : i32
    return %arg0, %c0_i32, %c0_i32_0 : i32, i32, i32
  }
  func.func @transform_1(%arg0: i32) -> (i32, i32) {
    %c0_i32 = arith.constant 0 : i32
    %c0_i32_0 = arith.constant 0 : i32
    %c0_i32_1 = arith.constant 0 : i32
    return %c0_i32, %c0_i32_0 : i32, i32
  }
  func.func @transform_2(%arg0: i32) -> (i32, i32) {
    %c0_i32 = arith.constant 0 : i32
    %c0_i32_0 = arith.constant 0 : i32
    %c0_i32_1 = arith.constant 0 : i32
    return %c0_i32, %c0_i32_0 : i32, i32
  }
  func.func @transform_3(%arg0: i32) -> (i32, i32) {
    %c0_i32 = arith.constant 0 : i32
    %c0_i32_0 = arith.constant 0 : i32
    %c0_i32_1 = arith.constant 0 : i32
    return %c0_i32, %c0_i32_0 : i32, i32
  }
  func.func @transform_4(%arg0: i32) -> (i32, i32) {
    %c0_i32 = arith.constant 0 : i32
    %c0_i32_0 = arith.constant 0 : i32
    %c0_i32_1 = arith.constant 0 : i32
    return %c0_i32, %c0_i32_0 : i32, i32
  }
  func.func @transform_5(%arg0: i32) -> (i32, i32) {
    %c0_i32 = arith.constant 0 : i32
    %c0_i32_0 = arith.constant 0 : i32
    %c0_i32_1 = arith.constant 0 : i32
    return %c0_i32, %c0_i32_0 : i32, i32
  }
  func.func @transform_6(%arg0: i32) -> (i32, i32) {
    %c0_i32 = arith.constant 0 : i32
    %c0_i32_0 = arith.constant 0 : i32
    %c0_i32_1 = arith.constant 0 : i32
    return %c0_i32, %c0_i32_0 : i32, i32
  }
  func.func @transform_7(%arg0: i32) -> (i32, i32) {
    %c0_i32 = arith.constant 0 : i32
    %c0_i32_0 = arith.constant 0 : i32
    %c0_i32_1 = arith.constant 0 : i32
    return %c0_i32, %c0_i32_0 : i32, i32
  }
  func.func @transform_8(%arg0: i32) -> (i32, i32, i32) {
    %c0_i32 = arith.constant 0 : i32
    %c0_i32_0 = arith.constant 0 : i32
    %c0_i32_1 = arith.constant 0 : i32
    return %arg0, %c0_i32, %c0_i32_0 : i32, i32, i32
  }
}

</mosaic_0001>

<bundles_post_ra>
// kernel: shuffle_unit_pallas.1
= control target key start
LH: loop header
LB: loop body
LE: loop exit
PB: predicated region body
PF: predicated region fallthrough
CT: control target
= control target key end

     0   :  { %s1347_s0 = inlined_call_operand.hbm [shape: f32[2,24,256], index: 0, kind: input, shape index: {}]   ;;  %s1348_s1 = inlined_call_operand.vmem [shape: f32[6,24], index: 1, kind: input, shape index: {}]   ;;  %s1349_s2 = inlined_call_operand.vmem [shape: f32[6,1], index: 2, kind: input, shape index: {}]   ;;  %s1350_s3 = inlined_call_operand.vmem [shape: f32[6,9], index: 3, kind: input, shape index: {}]   ;;  %s1351_s4 = inlined_call_operand.vmem [shape: f32[6,1], index: 4, kind: input, shape index: {}]   ;;  %s1352_s5 = inlined_call_operand.vmem [shape: f32[24,6], index: 5, kind: input, shape index: {}]   ;;  %s1353_s6 = inlined_call_operand.vmem [shape: f32[24,1], index: 6, kind: input, shape index: {}]   ;;  %s1354_s7 = inlined_call_operand.vmem [shape: f32[1,256], index: 7, kind: input, shape index: {}]   ;;  %s1355_s8 = inlined_call_operand.hbm [shape: f32[2,24,256], index: 8, kind: output, shape index: {}]  }
   0x1   :  { %1359 = sst [smem:[#allocation9_spill]] %s1347_s0 }
   0x2   :  { %13 = vsyncpa [#allocation3], 0 }
   0x3   :  { %15 = vsyncpa [#allocation3 + $0x1], 0 }
   0x4   :  { %16 = vsyncpa [#allocation4], 0 }
   0x5   :  { %18 = vsyncpa [#allocation4 + $0x1], 0  ;;  %s1079_s27 = smov 0   ;;  %s1081_s28 = smov 0  }
   0x6   :  { %s1083_s29 = smov 0   ;;  %s1085_s30 = smov 0  }
   0x7 LB: > { %s1100_s9 = sadd.s32 4294967295, %s1009_s30   ;;  %s821_s10 = sadd.s32 4294967294, %s1009_s30   ;;  %s1009_s30 = sphi %s1085_s30, %s1375_s30   ;;  %s1005_s29 = sphi %s1083_s29, %s1374_s29   ;;  %s1001_s28 = sphi %s1081_s28, %s1373_s28   ;;  %s997_s27 = sphi %s1079_s27, %s1372_s27  }
   0x8   : > { %s1104_s11 = sadd.s32 1, %s1009_s30   ;;  %s31_s12 = sadd.s32 1, %s1005_s29 }
   0x9   : > { %s28_s13 = ssub.s32 %s1009_s30, %s1104_s11  ;;  %p38_p0 = scmp.ne.s32.totalorder %s1005_s29, %s1001_s28 }
   0xa   : > { %p29_p1 = scmp.eq.s32.totalorder %s28_s13, 0  ;;  %p39_p2 = scmp.eq.s32.totalorder %s1009_s30, 0 }
   0xb   : > { %p44_p3 = scmp.ne.s32.totalorder %s1001_s28, %s997_s27  ;;  %p45_p4 = scmp.eq.s32.totalorder %s1100_s9, 0 }
   0xc   : > { %s1116_s14 = scalar_select %p29_p1, %s1005_s29, %s31_s12  }
   0xd   : > { %p40_p5 = por %p39_p2, %p38_p0  ;;  %p1118_p6 = por %p45_p4, %p44_p3 }
   0xe   : > { %1360 = sst [smem:[#allocation8_spill]] %s1116_s14  ;;  %p215_p7 = scmp.eq.s32.totalorder %s1100_s9, 1 }
   0xf   : > { %s1361_s15 = scalar_select %p1118_p6, 1, 0 }
  0x10   : > { %p221_p8 = scmp.eq.s32.totalorder %s821_s10, 1  ;;  %p851_p10 = scmp.lt.s32.totalorder %s1009_s30, 2 }
  0x11   : > { %p1125_p11 = por %p215_p7, %p38_p0  ;;  %s262_s18 = sand.u32 1, %s1005_s29  }
  0x12   : > { %p1129_p12 = por %p221_p8, %p44_p3  ;;  %s836_s19 = smul.u32 768, %s1009_s30 }
  0x13   : > { %s1362_s16 = scalar_select %p1125_p11, 1, 0 }
  0x14   : > { %s1363_s17 = scalar_select %p1129_p12, 1, 0 }
  0x15   : > { %s835_s20 = smul.u32 48, %s262_s18  ;;  %s1364_s0 = sld [smem:[#allocation9_spill]] }
  0x16   : > { %p1140_p13 = pnand %p851_p10, %p40_p5  ;;  %s1146_s10 = scalar_lea.sflag [#allocation3], %s262_s18 }
  0x17   : > { %s266_s25 = scalar_lea.vmem [#allocation2], %s835_s20 }
  0x18   : > { %s273_s26 = sshll.u32 %s266_s25, 4  ;;  %p919_p1 = pneg %p1140_p13  ;;  %s1144_s26 = int_to_ptr.vmem [resolvable:$true] %s273_s26 }
  0x1b   : > { %s1138_s23 = scalar_lea.hbm %s1364_s0, %s836_s19  ;;  %s922_s21 = scalar_lea.hbm %s1364_s0, 1536 }
  0x1c   : > { %s917_s12 = scalar_lea.hbm %s1138_s23, 768  ;;  %p923_p4 = scmp.lt.s32.totalorder %s1138_s23, %s1364_s0 }
  0x1d   : > { %p918_p0 = scmp.ne.s32.totalorder %s1138_s23, %s917_s12  ;;  %p924_p5 = scmp.lt.s32.totalorder %s922_s21, %s917_s12 }
  0x1f   : > { %p920_p2 = pnand %p919_p1, %p918_p0  ;;  %p925_p7 = por %p924_p5, %p923_p4 }
  0x21   : > { %p921_p3 = pneg %p920_p2 }
  0x23   : > { %p926_p8 = pnand %p925_p7, %p921_p3 }
  0x25   : > { %929 = shalt.err (!%p926_p8)
}
  0x26   : > { %s930_s18 = scalar_lea.vmem %s1144_s26, 768  ;;  %s1011_s20 = smov [#allocation2]  }
  0x27   : > { %p931_p10 = scmp.ne.s32.totalorder %s1144_s26, %s930_s18  ;;  %s935_s25 = sshll.u32 %s1011_s20, 4  ;;  %s936_s25 = int_to_ptr.vmem [resolvable:$false] %s935_s25 }
  0x28   : > { %s937_s13 = scalar_lea.vmem %s936_s25, 1536  ;;  %p938_p2 = scmp.lt.s32.totalorder %s1144_s26, %s936_s25 }
  0x29   : > { %p933_p9 = pnand %p931_p10, %p919_p1  ;;  %p939_p12 = scmp.lt.s32.totalorder %s937_s13, %s930_s18 }
  0x2b   : > { %p934_p0 = pneg %p933_p9  ;;  %p940_p11 = por %p939_p12, %p938_p2 }
  0x2d   : > { %p941_p6 = pnand %p940_p11, %p934_p0 }
  0x2f   : > { %944 = shalt.err (!%p941_p6)
}
  0x30   : > { %s1012_s14 = smov 256   ;;  %s1013_s12 = smov 16  }
  0x31   : > { %846 = dma.hbm_to_vmem [thread:$0]  (!%p1140_p13), %s1138_s23, 768, %s1144_s26, %s1146_s10, %s1012_s14, %s1012_s14, %s1013_s12  }
  0x32   : > { %p825_p9 = scmp.ge.s32.totalorder %s1009_s30, 1  ;;  %p281_p1 = scmp.lt.s32.totalorder %s1009_s30, 3 }
  0x34   : > { %p282_p3 = pnand %p825_p9, %p281_p1 }
  0x35   : > { %s1170_s19 = sand.u32 (!%p282_p3), 1, %s1001_s28   ;;  %p1366_p6 = scmp.ne.s32.totalorder (!%p282_p3), %s1361_s15, 0 }
  0x36   : > { %285 = sbr.rel (%p282_p3) target bundleno = 654 (0x28e), region = 52  ;;  %s288_s22 = scalar_lea.sflag (!%p282_p3), [#allocation3], %s1170_s19 }
  0x37   : > { %s1358_s21 = smul.u32 (!%p282_p3), 48, %s1170_s19 }
  0x39   : > { %s291_s18 = scalar_lea.vmem (!%p282_p3), [#allocation2], %s1358_s21 }
  0x3b   : > { %988 = dma.done.wait (%p1366_p6), %s288_s22, 768  }
  0x3c   : > { %990 = vsyncadd (%p1366_p6), %s288_s22, 4294966528  ;;  %v1014_v0 = vmov 0.0   ;;  %v1015_v1 = vmov 0   ;;  %v1016_v2 = vmov 1   ;;  %v1183_v3 = vld [vmem:[%s291_s18 + $0x28] sm:$0xff]  ;;  %v1185_v4 = vld [vmem:[%s291_s18 + $0x20] sm:$0xff]  ;;  %v417_v45 = vlaneseq }
  0x3d   : > { %405 = vmatprep.mubr.f32.mxu0 %v1014_v0  ;;  %906 = vset.pattern.permute.xlu0 %v1015_v1  ;;  %v1187_v5 = vld [vmem:[%s291_s18 + $0x18] sm:$0xff]  ;;  %v1190_v6 = vld [vmem:[%s291_s18 + $0x10] sm:$0xff]  ;;  %v1193_v7 = vld [vmem:[%s291_s18 + $0x8] sm:$0xff]  ;;  %vm337_vm0 = vcmask 195584   ;;  %v1017_v12 = vmov 3   ;;  %v1018_v13 = vmov 2  }
  0x3e   : > { %907 = vset.pattern.permute.xlu1 %v1016_v2  ;;  %654 = vmatprep.mubr.f32.mxu1 %v1014_v0  ;;  %v331_v8 = vld [vmem:[%s1349_s2] sm:$0x3f]  ;;  %v1019_v14 = vmov 4   ;;  %v1020_v15 = vmov 6   ;;  %v1021_v16 = vmov 5   ;;  %v1022_v17 = vmov 7  }
  0x3f   : > { %367 = vmatprep.subr.mxu0 %v1183_v3  ;;  %v1199_v9 = vld [vmem:[%s291_s18] sm:$0xff]  ;;  %334 = vperm.xlu0 %906, %v331_v8   ;;  %v1023_v18 = vmov 8   ;;  %s1024_s25 = smov 15   ;;  %s1025_s13 = smov 17   ;;  %v556_v26 = vld [vmem:[%s1353_s6 + $0x8] sm:$0xff]  ;;  %v1251_v47 = vand.u32 127, %v417_v45 }
  0x40   : > { %368 = vmatpush1.msra.mxu0 %v1185_v4  ;;  %v412_v10 = vld [vmem:[%s1350_s3] sm:$0x3f]  ;;  %s1026_s14 = smov 1   ;;  %s1027_s12 = smov 16   ;;  %v557_v25 = vld [vmem:[%s1353_s6 + $0x10] sm:$0xff]  ;;  %v680_v27 = vmax.f32 %v556_v26, 0.0 }
  0x41   : > { %369 = vmatprep.subr.mxu0 %v1187_v5  ;;  %v330_v11 = vld [vmem:[%s1348_s1] sm:$0x3f]  ;;  %439 = vperm.xlu1 %907, %v412_v10   ;;  %s1028_s22 = smov 127   ;;  %s1029_s18 = smov 113   ;;  %v681_v30 = vmax.f32 %v557_v25, 0.0  ;;  %vm435_vm1 = vcmp.lt.s32.totalorder %v1251_v47, 16 }
  0x42   : > { %370 = vmatpush1.msra.mxu0 %v1190_v6  ;;  %s1030_s15 = smov 112   ;;  %s1031_s23 = smov 111   ;;  %v544_v24 = vld [vmem:[%s1351_s4] sm:$0x3f]  ;;  %vm419_vm2 = vcmp.lt.s32.totalorder %v1251_v47, 17  ;;  %vm450_vm3 = vcmp.lt.s32.totalorder %v1251_v47, 15 }
  0x43   : > { %371 = vmatprep.subr.mxu0 %v1193_v7  ;;  %909 = vset.pattern.permute.xlu0 %v1017_v12  ;;  %v555_v28 = vld [vmem:[%s1353_s6] sm:$0xff]  ;;  %vm465_vm4 = vcmp.lt.s32.totalorder %v1251_v47, 1  ;;  %vm488_vm5 = vcmp.lt.s32.totalorder %v1251_v47, 127  ;;  %vm503_vm6 = vcmp.lt.s32.totalorder %v1251_v47, 113  ;;  %vm518_vm7 = vcmp.lt.s32.totalorder %v1251_v47, 112  ;;  %s1367_s26 = smul.u32 48, %s1170_s19 }
  0x44   : > { %372 = vmatpush1.msra.mxu0 %v1199_v9  ;;  %469 = vperm.xlu0 %909, %v412_v10   ;;  %v679_v29 = vmax.f32 %v555_v28, 0.0  ;;  %vm533_vm8 = vcmp.lt.s32.totalorder %v1251_v47, 111  ;;  %vm583_vm9 = vcmask 1045504   ;;  %vm573_vm10 = vcmask 48128   ;;  %s838_s20 = smul.u32 768, %s1100_s9  ;;  %s735_s9 = scalar_lea.sflag [#allocation4], %s1170_s19 }
  0x45   : > { %826 = vmatmul.mubr.msk.f32.vlgmr.msra.gmra.mxu0 %vm337_vm0, %v330_v11  ;;  %908 = vset.pattern.permute.xlu1 %v1018_v13  ;;  %s323_s10 = scalar_lea.vmem [#allocation5], %s1367_s26  ;;  %p1368_p12 = scmp.ne.s32.totalorder %s1362_s16, 0 }
  0x46   : > { %454 = vperm.xlu1 %908, %v412_v10   ;;  %s1301_s21 = scalar_lea.hbm %s1355_s8, %s838_s20 }
  0x48   : > { %910 = vset.pattern.permute.xlu0 %v1019_v14 }
  0x49   : > { %477 = vperm.xlu0 %910, %v412_v10  }
  0x4a   : > { %912 = vset.pattern.permute.xlu1 %v1020_v15 }
  0x4b   : > { %507 = vperm.xlu1 %912, %v412_v10  }
  0x4d   : > { %911 = vset.pattern.permute.xlu0 %v1021_v16 }
  0x4e   : > { %492 = vperm.xlu0 %911, %v412_v10  }
  0x4f   : > { %913 = vset.pattern.permute.xlu1 %v1022_v17 }
  0x50   : > { %522 = vperm.xlu1 %913, %v412_v10  }
  0x52   : > { %914 = vset.pattern.permute.xlu0 %v1023_v18 }
  0x53   : > { %537 = vperm.xlu0 %914, %v412_v10  }
  0x54   : > { %916 = vset.pattern.permute.xlu1 %v1015_v1 }
  0x57   : > { %915 = vset.pattern.permute.xlu0 %v1015_v1 }
  0x58   : > { %424 = vperm.xlu0 %915, %v412_v10  }
  0xba   : > { %v335_v19 = vpop.permute.xlu0 %334 }
  0xbc   : > { %v440_v31 = vpop.permute.xlu1 %439 }
  0xbf   : > { %v470_v32 = vpop.permute.xlu0 %469 }
  0xc1   : > { %v455_v33 = vpop.permute.xlu1 %454 }
  0xc4   : > { %v478_v34 = vpop.permute.xlu0 %477 }
  0xc6   : > { %v508_v35 = vpop.permute.xlu1 %507 }
  0xc9   : > { %v493_v36 = vpop.permute.xlu0 %492 }
  0xcb   : > { %v1246_v37 = vpop.permute.xlu1 %522 }
  0xce   : > { %v1248_v38 = vpop.permute.xlu0 %537 }
  0xd3   : > { %v425_v40 = vpop.permute.xlu0 %424 }
 0x105   : > { %v407_v20 = vpop.f32.mrf.mxu0 }
 0x106   : > { %v1212_v21 = vadd.f32 %v407_v20, %v335_v19 }
 0x107   : > { %v409_v22 = vpop.f32.mrf.mxu0 }
 0x108   : > { %446 = vrot.lane.b32.xlu1 %v1212_v21, %s1024_s25  ;;  %413 = vrot.lane.b32.xlu0 %v1212_v21, %s1025_s13  ;;  %v1221_v23 = vadd.f32 %v409_v22, %v335_v19  ;;  %v480_v20 = vmul.f32 %v478_v34, %v1212_v21 }
 0x10a   : > { %v481_v22 = vmul.f32 %v478_v34, %v1221_v23 }
 0x10c   : > { %461 = vrot.lane.b32.xlu1 %v1212_v21, %s1026_s14  ;;  %431 = vrot.lane.b32.xlu0 %v1212_v21, %s1027_s12 }
 0x110   : > { %484 = vrot.lane.b32.xlu1 %v1212_v21, %s1028_s22  ;;  %499 = vrot.lane.b32.xlu0 %v1212_v21, %s1029_s18 }
 0x114   : > { %514 = vrot.lane.b32.xlu1 %v1212_v21, %s1030_s15  ;;  %486 = vrot.lane.b32.xlu0 %v1221_v23, %s1028_s22 }
 0x118   : > { %415 = vrot.lane.b32.xlu1 %v1221_v23, %s1025_s13  ;;  %529 = vrot.lane.b32.xlu0 %v1212_v21, %s1031_s23  ;;  %s748_s13 = sshll.u32 %s323_s10, 4  ;;  %s1303_s13 = int_to_ptr.vmem [resolvable:$true] %s748_s13 }
 0x11c   : > { %433 = vrot.lane.b32.xlu1 %v1221_v23, %s1027_s12  ;;  %547 = vperm.xlu0 %915, %v544_v24  }
 0x120   : > { %448 = vrot.lane.b32.xlu1 %v1221_v23, %s1024_s25  ;;  %570 = vperm.xlu0 %915, %v557_v25   ;;  %s945_s25 = scalar_lea.vmem %s1303_s13, 768 }
 0x121   : > { %p946_p11 = scmp.ne.s32.totalorder %s1303_s13, %s945_s25 }
 0x123   : > { %p947_p13 = pnand %p946_p11, %p1368_p12 }
 0x124   : > { %463 = vrot.lane.b32.xlu1 %v1221_v23, %s1026_s14  ;;  %702 = vperm.xlu0 %915, %v680_v27   ;;  %s1032_s14 = smov [#allocation5]  }
 0x125   : > { %p948_p4 = pneg %p947_p13 }
 0x128   : > { %501 = vrot.lane.b32.xlu1 %v1221_v23, %s1029_s18  ;;  %s949_s18 = sshll.u32 %s1032_s14, 4  ;;  %s950_s18 = int_to_ptr.vmem [resolvable:$false] %s949_s18 }
 0x129   : > { %p952_p5 = scmp.lt.s32.totalorder %s1303_s13, %s950_s18 }
 0x12c   : > { %516 = vrot.lane.b32.xlu1 %v1221_v23, %s1030_s15  ;;  %s951_s15 = scalar_lea.vmem %s950_s18, 1536 }
 0x12d   : > { %p953_p7 = scmp.lt.s32.totalorder %s951_s15, %s945_s25 }
 0x12f   : > { %p954_p8 = por %p953_p7, %p952_p5 }
 0x130   : > { %531 = vrot.lane.b32.xlu1 %v1221_v23, %s1031_s23 }
 0x131   : > { %p955_p10 = pnand %p954_p8, %p948_p4 }
 0x134   : > { %560 = vperm.xlu1 %916, %v555_v28  }
 0x138   : > { %565 = vperm.xlu1 %916, %v556_v26  }
 0x13c   : > { %697 = vperm.xlu1 %916, %v679_v29  }
 0x140   : > { %707 = vperm.xlu1 %916, %v681_v30  }
 0x17a   : > { %v447_v39 = vpop.permute.xlu1 %446  ;;  %v414_v43 = vpop.permute.xlu0 %413 }
 0x17e   : > { %v462_v41 = vpop.permute.xlu1 %461  ;;  %v432_v46 = vpop.permute.xlu0 %431 }
 0x182   : > { %v485_v42 = vpop.permute.xlu1 %484  ;;  %v500_v52 = vpop.permute.xlu0 %499 }
 0x186   : > { %v515_v44 = vpop.permute.xlu1 %514  ;;  %v487_v2 = vpop.permute.xlu0 %486 }
 0x187   : > { %v489_v18 = vsel %vm488_vm5, %v485_v42, %v487_v2  ;;  %v490_v19 = vsel %vm488_vm5, %v487_v2, %v485_v42 }
 0x188   : > { %v495_v29 = vmul.f32 %v493_v36, %v489_v18  ;;  %v496_v30 = vmul.f32 %v493_v36, %v490_v19 }
 0x18a   : > { %v416_v48 = vpop.permute.xlu1 %415 }
 0x18b   : > { %v420_v53 = vsel %vm419_vm2, %v414_v43, %v416_v48  ;;  %v421_v54 = vsel %vm419_vm2, %v416_v48, %v414_v43 }
 0x18c   : > { %v427_v60 = vmul.f32 %v425_v40, %v421_v54  ;;  %v428_v61 = vmul.f32 %v425_v40, %v420_v53 }
 0x18e   : > { %v434_v49 = vpop.permute.xlu1 %433 }
 0x18f   : > { %v436_v50 = vsel %vm435_vm1, %v432_v46, %v434_v49  ;;  %v437_v51 = vsel %vm435_vm1, %v434_v49, %v432_v46  ;;  %v530_v49 = vpop.permute.xlu0 %529 }
 0x190   : > { %v442_v55 = vmul.f32 %v440_v31, %v437_v51  ;;  %v443_v56 = vmul.f32 %v440_v31, %v436_v50 }
 0x192   : > { %v449_v57 = vpop.permute.xlu1 %448  ;;  %v444_v8 = vadd.f32 %v442_v55, %v427_v60  ;;  %v445_v10 = vadd.f32 %v443_v56, %v428_v61  ;;  %v686_v60 = vshrl.u32 %v417_v45, 7 }
 0x193   : > { %v451_v58 = vsel %vm450_vm3, %v447_v39, %v449_v57  ;;  %v452_v59 = vsel %vm450_vm3, %v449_v57, %v447_v39 }
 0x194   : > { %v457_v62 = vmul.f32 %v455_v33, %v452_v59  ;;  %v458_v63 = vmul.f32 %v455_v33, %v451_v58  ;;  %v554_v58 = vld [vmem:[%s1352_s5 + $0x10] sm:$0xff]  ;;  %v682_v59 = vld [vmem:[%s1354_s7] sm:$0x3]  ;;  %v691_v2 = vsub.s32 1, %v686_v60 }
 0x195   : > { %vm683_vm11 = vcmp.ne.f32.partialorder %v682_v59, 0.0 }
 0x196   : > { %v464_v11 = vpop.permute.xlu1 %463  ;;  %v459_v14 = vadd.f32 %v457_v62, %v444_v8  ;;  %v460_v15 = vadd.f32 %v458_v63, %v445_v10  ;;  %v687_v62 = vsub.s32 0, %v686_v60  ;;  %v684_v63 = vsel %vm683_vm11, 1, %v1015_v1 }
 0x197   : > { %v466_v12 = vsel %vm465_vm4, %v462_v41, %v464_v11  ;;  %v467_v13 = vsel %vm465_vm4, %v464_v11, %v462_v41  ;;  %v548_v56 = vpop.permute.xlu0 %547  ;;  %v692_v11 = vrot.slane %v684_v63, %v691_v2 }
 0x198   : > { %v472_v16 = vmul.f32 %v470_v32, %v467_v13  ;;  %v473_v17 = vmul.f32 %v470_v32, %v466_v12  ;;  %v688_v10 = vrot.slane %v684_v63, %v687_v62 }
 0x199   : > { %vm694_vm13 = vcmp.eq.s32.totalorder %v692_v11, 1 }
 0x19a   : > { %v474_v24 = vadd.f32 %v472_v16, %v459_v14  ;;  %v475_v25 = vadd.f32 %v473_v17, %v460_v15  ;;  %v502_v26 = vpop.permute.xlu1 %501  ;;  %vm693_vm12 = vcmp.eq.s32.totalorder %v688_v10, 1 }
 0x19b   : > { %v504_v27 = vsel %vm503_vm6, %v500_v52, %v502_v26  ;;  %v505_v28 = vsel %vm503_vm6, %v502_v26, %v500_v52  ;;  %v571_v13 = vpop.permute.xlu0 %570 }
 0x19c   : > { %v482_v31 = vadd.f32 %v480_v20, %v474_v24  ;;  %v483_v33 = vadd.f32 %v481_v22, %v475_v25  ;;  %v510_v32 = vmul.f32 %v508_v35, %v504_v27  ;;  %v511_v41 = vmul.f32 %v508_v35, %v505_v28 }
 0x19e   : > { %v497_v39 = vadd.f32 %v495_v29, %v482_v31  ;;  %v498_v40 = vadd.f32 %v496_v30, %v483_v33  ;;  %v517_v42 = vpop.permute.xlu1 %516 }
 0x19f   : > { %v519_v43 = vsel %vm518_vm7, %v515_v44, %v517_v42  ;;  %v520_v21 = vsel %vm518_vm7, %v517_v42, %v515_v44  ;;  %v703_v27 = vpop.permute.xlu0 %702 }
 0x1a0   : > { %v512_v23 = vadd.f32 %v510_v32, %v497_v39  ;;  %v513_v34 = vadd.f32 %v511_v41, %v498_v40  ;;  %v525_v46 = vmul.f32 %v1246_v37, %v519_v43  ;;  %v526_v48 = vmul.f32 %v1246_v37, %v520_v21  ;;  %v552_v37 = vld [vmem:[%s1352_s5] sm:$0xff] }
 0x1a2   : > { %v532_v50 = vpop.permute.xlu1 %531  ;;  %v527_v52 = vadd.f32 %v525_v46, %v512_v23  ;;  %v528_v53 = vadd.f32 %v526_v48, %v513_v34 }
 0x1a3   : > { %v534_v36 = vsel %vm533_vm8, %v530_v49, %v532_v50  ;;  %v535_v51 = vsel %vm533_vm8, %v532_v50, %v530_v49 }
 0x1a4   : > { %v540_v54 = vmul.f32 %v1248_v38, %v534_v36  ;;  %v541_v35 = vmul.f32 %v1248_v38, %v535_v51  ;;  %v553_v38 = vld [vmem:[%s1352_s5 + $0x8] sm:$0xff] }
 0x1a6   : > { %v542_v55 = vadd.f32 %v540_v54, %v527_v52  ;;  %v543_v44 = vadd.f32 %v541_v35, %v528_v53 }
 0x1a8   : > { %v551_v47 = vadd.f32 %v548_v56, %v543_v44  ;;  %v550_v57 = vadd.f32 %v548_v56, %v542_v55 }
 0x1aa   : > { %827 = vmatprep.subr.msk.mxu1 %vm583_vm9, %v551_v47 }
 0x1ab   : > { %828 = vmatpush1.msk.msra.mxu1 %vm583_vm9, %v550_v57 }
 0x1ac   : > { %829 = vmatmul.mubr.msk.f32.vlgmr.msra.gmra.mxu1 %vm573_vm10, %v552_v37 }
 0x1ad   : > { %660 = vmatprep.mubr.f32.mxu1 %v1014_v0 }
 0x1af   : > { %v561_v61 = vpop.permute.xlu1 %560 }
 0x1b0   : > { %830 = vmatmul.mubr.msk.f32.gmra.mxu1 %vm573_vm10, %v553_v38 }
 0x1b1   : > { %666 = vmatprep.mubr.f32.mxu1 %v1014_v0 }
 0x1b3   : > { %v566_v8 = vpop.permute.xlu1 %565 }
 0x1b4   : > { %831 = vmatmul.mubr.msk.f32.gmra.mxu1 %vm573_vm10, %v554_v58 }
 0x1b7   : > { %v698_v17 = vpop.permute.xlu1 %697 }
 0x1bb   : > { %v708_v21 = vpop.permute.xlu1 %707 }
 0x26c   : > { %v656_v0 = vpop.f32.mrf.mxu1 }
 0x26d   : > { %v657_v12 = vadd.f32 %v656_v0, %v561_v61 }
 0x26e   : > { %v658_v14 = vpop.f32.mrf.mxu1 }
 0x26f   : > { %v673_v15 = vmax.f32 %v657_v12, 0.0  ;;  %v659_v16 = vadd.f32 %v658_v14, %v561_v61 }
 0x270   : > { %v662_v18 = vpop.f32.mrf.mxu1 }
 0x271   : > { %v710_v45 = vsel %vm693_vm12, %v673_v15, %v698_v17  ;;  %v674_v19 = vmax.f32 %v659_v16, 0.0  ;;  %v663_v20 = vadd.f32 %v662_v18, %v566_v8 }
 0x272   : > { %v716_v1 = vadd.f32 %v710_v45, %v1199_v9  ;;  %v664_v22 = vpop.f32.mrf.mxu1 }
 0x273   : > { %v711_v24 = vsel %vm694_vm13, %v674_v19, %v698_v17  ;;  %v675_v25 = vmax.f32 %v663_v20, 0.0  ;;  %v665_v26 = vadd.f32 %v664_v22, %v566_v8 }
 0x274   : > { %v722_v28 = vmax.f32 %v716_v1, 0.0  ;;  %v717_v29 = vadd.f32 %v711_v24, %v1193_v7  ;;  %v668_v30 = vpop.f32.mrf.mxu1 }
 0x275   : > { %v712_v31 = vsel %vm693_vm12, %v675_v25, %v703_v27  ;;  %v676_v33 = vmax.f32 %v665_v26, 0.0  ;;  %v669_v39 = vadd.f32 %v668_v30, %v571_v13 }
 0x276   : > { %728 = vst [vmem:[%s323_s10] sm:$0xff] %v722_v28  ;;  %v723_v40 = vmax.f32 %v717_v29, 0.0  ;;  %v718_v9 = vadd.f32 %v712_v31, %v1190_v6  ;;  %v670_v32 = vpop.f32.mrf.mxu1 }
 0x277   : > { %v713_v41 = vsel %vm694_vm13, %v676_v33, %v703_v27  ;;  %v677_v42 = vmax.f32 %v669_v39, 0.0  ;;  %v671_v43 = vadd.f32 %v670_v32, %v571_v13 }
 0x278   : > { %729 = vst [vmem:[%s323_s10 + $0x8] sm:$0xff] %v723_v40  ;;  %v724_v7 = vmax.f32 %v718_v9, 0.0  ;;  %v719_v23 = vadd.f32 %v713_v41, %v1187_v5 }
 0x279   : > { %v714_v34 = vsel %vm693_vm12, %v677_v42, %v708_v21  ;;  %v678_v46 = vmax.f32 %v671_v43, 0.0 }
 0x27a   : > { %730 = vst [vmem:[%s323_s10 + $0x10] sm:$0xff] %v724_v7  ;;  %v725_v48 = vmax.f32 %v719_v23, 0.0  ;;  %v720_v6 = vadd.f32 %v714_v34, %v1185_v4 }
 0x27b   : > { %v715_v49 = vsel %vm694_vm13, %v678_v46, %v708_v21 }
 0x27c   : > { %731 = vst [vmem:[%s323_s10 + $0x18] sm:$0xff] %v725_v48  ;;  %v726_v50 = vmax.f32 %v720_v6, 0.0  ;;  %v721_v36 = vadd.f32 %v715_v49, %v1183_v3 }
 0x27e   : > { %732 = vst [vmem:[%s323_s10 + $0x20] sm:$0xff] %v726_v50  ;;  %v727_v5 = vmax.f32 %v721_v36, 0.0 }
 0x280   : > { %733 = vst [vmem:[%s323_s10 + $0x28] sm:$0xff] %v727_v5 }
 0x281   : > { %958 = shalt.err (!%p955_p10)
}
 0x282   : > { %s959_s23 = scalar_lea.hbm %s1301_s21, 768  ;;  %s963_s10 = scalar_lea.hbm %s1355_s8, 1536 }
 0x283   : > { %p960_p0 = scmp.ne.s32.totalorder %s1301_s21, %s959_s23  ;;  %p964_p1 = scmp.lt.s32.totalorder %s1301_s21, %s1355_s8 }
 0x284   : > { %p965_p3 = scmp.lt.s32.totalorder %s963_s10, %s959_s23 }
 0x285   : > { %p961_p2 = pnand %p960_p0, %p1368_p12 }
 0x286   : > { %p966_p6 = por %p965_p3, %p964_p1 }
 0x287   : > { %p962_p9 = pneg %p961_p2 }
 0x289   : > { %p967_p11 = pnand %p966_p6, %p962_p9 }
 0x28b   : > { %970 = shalt.err (!%p967_p11)
}
 0x28c   : > { %s1033_s0 = smov 256  }
 0x28d   : > { %841 = dma.vmem_to_hbm [thread:$0]  (%p1368_p12), %s1303_s13, 768, %s1301_s21, %s735_s9, %s1033_s0, %s1033_s0, %s1027_s12  }
 0x28e PF: > { %s763_s25 = sand.u32 1, %s997_s27   ;;  %p1369_p13 = scmp.ne.s32.totalorder %s1363_s17, 0 }
 0x28f   : > { %p1370_p4 = scmp.ge.s32.totalorder %s1009_s30, 2  ;;  %s764_s14 = scalar_lea.sflag [#allocation4], %s763_s25 }
 0x291   : > { %p848_p5 = pnand %p1370_p4, %p1369_p13 }
 0x293   : > { %p849_p7 = pneg %p848_p5 }
 0x295   : > { %992 = dma.done.wait (%p849_p7), %s764_s14, 768  }
 0x296   : > { %994 = vsyncadd (%p849_p7), %s764_s14, 4294966528  ;;  %s1371_s16 = sld [smem:[#allocation8_spill]]  ;;  %p21_p8 = scmp.ge.s32.totalorder %s1104_s11, 4  }
 0x297   : > { %s1372_s27 = smov %s1001_s28  ;;  %s1373_s28 = smov %s1005_s29 }
 0x298   : > { %s1375_s30 = smov %s1104_s11  ;;  %23 = sbr.rel (!%p21_p8) target bundleno = 7 (0x7), region = 97 }
 0x29c   : > { %s1374_s29 = smov %s1371_s16 }
 0x29d   :  { %769 = vsyncpa [#allocation3], 1 }
 0x29e   :  { %771 = vsyncpa [#allocation3 + $0x1], 1 }
 0x29f   :  { %772 = vsyncpa [#allocation4], 1 }
 0x2a0   :  { %774 = vsyncpa [#allocation4 + $0x1], 1 }

</bundles_post_ra>
